<compile_context>
chip_gen: v5e
topology: v5e:2x2
jax: 0.10.0
libtpu: 0.0.40
codegen_flags: <defaults>
</compile_context>

<pallas_src>
import jax
import jax.numpy as jnp
from jax.experimental import pallas as pl
from jax.experimental.pallas import tpu as pltpu


def _round_up(x, m):
    return (x + m - 1) // m * m


def _make_logits_kernel(tile_rows):
    """Lean kernel for the targets=None path: logits only."""

    def kernel(idx_ref, table_ref, logits_ref):
        v_pad = table_ref.shape[1]
        idx = idx_ref[...]                                          # (tile, 1)
        col = jax.lax.broadcasted_iota(jnp.int32, (tile_rows, v_pad), 1)
        onehot = (col == idx).astype(jnp.float32)                   # (tile, 128)
        logits_ref[...] = jnp.dot(onehot, table_ref[...],
                                  preferred_element_type=jnp.float32)

    return kernel


def _make_loss_kernel(vocab, n_true, tile_rows, store_logits):
    """Kernel computing (optionally) a logits tile + per-row cross-entropy."""

    def kernel(idx_ref, tgt_ref, table_ref, *out_refs):
        if store_logits:
            logits_ref, loss_row_ref = out_refs
        else:
            (loss_row_ref,) = out_refs

        i = pl.program_id(0)
        v_pad = table_ref.shape[1]

        idx = idx_ref[...]                                          # (tile, 1)
        tgt = tgt_ref[...]                                          # (tile, 1)
        col = jax.lax.broadcasted_iota(jnp.int32, (tile_rows, v_pad), 1)

        # Embedding lookup: exact f32 one-hot @ table on the MXU.
        onehot = (col == idx).astype(jnp.float32)                   # (tile, 128)
        logits = jnp.dot(onehot, table_ref[...],
                         preferred_element_type=jnp.float32)        # (tile, 128)
        if store_logits:
            logits_ref[...] = logits                                # lane-dense store

        # Cross entropy over the valid vocab columns only.
        masked = jnp.where(col < vocab, logits, -jnp.inf)
        m = jnp.max(masked, axis=-1, keepdims=True)                 # (tile, 1)
        lse = m + jnp.log(jnp.sum(jnp.exp(masked - m), axis=-1, keepdims=True))
        tgt_logit = jnp.sum(jnp.where(col == tgt, logits, 0.0),
                            axis=-1, keepdims=True)                 # (tile, 1)

        # Zero padded rows; each grid step owns its own output block, so the
        # grid axis stays fully parallel (megacore-shardable on v7x).
        row = jax.lax.broadcasted_iota(jnp.int32, (tile_rows, 1), 0) + i * tile_rows
        loss_row_ref[...] = jnp.where(row < n_true, lse - tgt_logit, 0.0)

    return kernel


def bigram_forward(idx, targets, table, *, row_tile=1024,
                   return_logits=True, trim_logits=True):
    """Pallas equivalent of BigramLanguageModel.forward(idx, targets).

    Returns (logits, loss).
      * targets given, return_logits=True : logits (B*T, V) (or padded slab if
        trim_logits=False), scalar loss.
      * targets given, return_logits=False: (None, loss) — fast training path,
        skips the logits HBM writeback entirely.
      * targets=None: logits (B, T, V) (or padded slab), loss None.
    """
    B, T = idx.shape
    V = table.shape[0]
    N = B * T

    v_pad = _round_up(max(V, 128), 128)            # lane-dense vocab axis
    tile = max(8, _round_up(min(row_tile, N), 8))  # rows per grid step, mult of 8
    n_pad = _round_up(N, tile)
    grid = (n_pad // tile,)

    table_pad = jnp.zeros((v_pad, v_pad), jnp.float32).at[:V, :V].set(
        table.astype(jnp.float32))
    idx_flat = jnp.zeros((n_pad, 1), jnp.int32).at[:N, 0].set(
        idx.reshape(N).astype(jnp.int32))

    ids_spec = pl.BlockSpec((tile, 1), lambda i: (i, 0))
    table_spec = pl.BlockSpec((v_pad, v_pad), lambda i: (0, 0))   # VMEM-resident
    logits_spec = pl.BlockSpec((tile, v_pad), lambda i: (i, 0))
    logits_shape = jax.ShapeDtypeStruct((n_pad, v_pad), jnp.float32)
    loss_spec = pl.BlockSpec((tile, 1), lambda i: (i, 0))
    loss_shape = jax.ShapeDtypeStruct((n_pad, 1), jnp.float32)
    params = pltpu.CompilerParams(dimension_semantics=("parallel",))

    if targets is None:
        logits_pad = pl.pallas_call(
            _make_logits_kernel(tile),
            out_shape=logits_shape,
            grid=grid,
            in_specs=[ids_spec, table_spec],
            out_specs=logits_spec,
            compiler_params=params,
        )(idx_flat, table_pad)
        if trim_logits:
            return logits_pad[:N, :V].reshape(B, T, V), None
        return logits_pad, None                    # valid region: [:N, :V]

    tgt_flat = jnp.zeros((n_pad, 1), jnp.int32).at[:N, 0].set(
        targets.reshape(N).astype(jnp.int32))

    if return_logits:
        logits_pad, per_row = pl.pallas_call(
            _make_loss_kernel(V, N, tile, True),
            out_shape=(logits_shape, loss_shape),
            grid=grid,
            in_specs=[ids_spec, ids_spec, table_spec],
            out_specs=(logits_spec, loss_spec),
            compiler_params=params,
        )(idx_flat, tgt_flat, table_pad)
        loss = jnp.sum(per_row) / jnp.float32(N)
        if trim_logits:
            return logits_pad[:N, :V], loss
        return logits_pad, loss                    # valid region: [:N, :V]

    # Loss-only training path: no logits store at all.
    per_row = pl.pallas_call(
        _make_loss_kernel(V, N, tile, False),
        out_shape=loss_shape,
        grid=grid,
        in_specs=[ids_spec, ids_spec, table_spec],
        out_specs=loss_spec,
        compiler_params=params,
    )(idx_flat, tgt_flat, table_pad)
    return None, jnp.sum(per_row) / jnp.float32(N)


def reference_forward(idx, targets, table):
    """Pure-JAX reference mirroring the PyTorch module."""
    logits = table[idx]                                  # (B, T, V)
    if targets is None:
        return logits, None
    B, T, V = logits.shape
    lf = logits.reshape(B * T, V)
    tf = targets.reshape(B * T)
    lse = jax.nn.logsumexp(lf, axis=-1)
    tgt_logit = jnp.take_along_axis(lf, tf[:, None], axis=-1)[:, 0]
    return lf, jnp.mean(lse - tgt_logit)


if __name__ == "__main__":
    vocab_size = 65          # e.g. tiny-shakespeare char vocab
    key = jax.random.PRNGKey(0)
    k_table, k_idx, k_tgt, k_idx2, k_tgt2, k_idx3, k_tgt3 = jax.random.split(key, 7)

    # nn.Embedding default init: N(0, 1)
    table = jax.random.normal(k_table, (vocab_size, vocab_size),
                              dtype=jnp.float32)

    # --- small shape from the module spec (B=2, T=8) ---
    B, T = 2, 8
    idx = jax.random.randint(k_idx, (B, T), 0, vocab_size, dtype=jnp.int32)
    targets = jax.random.randint(k_tgt, (B, T), 0, vocab_size, dtype=jnp.int32)

    logits, loss = bigram_forward(idx, targets, table)
    jax.block_until_ready((logits, loss))
    ref_logits, ref_loss = reference_forward(idx, targets, table)
    assert logits.shape == (B * T, vocab_size)
    assert jnp.allclose(logits, ref_logits, atol=1e-5, rtol=1e-5)
    assert jnp.allclose(loss, ref_loss, atol=1e-5, rtol=1e-5)

    # Loss-only training path (no logits writeback).
    none_logits, loss_only = bigram_forward(idx, targets, table,
                                            return_logits=False)
    jax.block_until_ready(loss_only)
    assert none_logits is None
    assert jnp.allclose(loss_only, ref_loss, atol=1e-5, rtol=1e-5)

    # Padded (no-trim) path: no wrapper-side slice over the logits slab.
    logits_pad, loss_pad = bigram_forward(idx, targets, table,
                                          trim_logits=False)
    jax.block_until_ready((logits_pad, loss_pad))
    assert logits_pad.shape[1] % 128 == 0
    assert jnp.allclose(logits_pad[:B * T, :vocab_size], ref_logits,
                        atol=1e-5, rtol=1e-5)
    assert jnp.allclose(loss_pad, ref_loss, atol=1e-5, rtol=1e-5)

    # targets=None path (lean logits-only kernel, shape (B, T, V))
    logits_nt, loss_nt = bigram_forward(idx, None, table)
    jax.block_until_ready(logits_nt)
    assert loss_nt is None and logits_nt.shape == (B, T, vocab_size)
    assert jnp.allclose(logits_nt.reshape(B * T, vocab_size), ref_logits,
                        atol=1e-5, rtol=1e-5)

    # --- multi-step grid with a small explicit tile (per-tile partial loss) ---
    B2, T2 = 8, 64            # N = 512 -> 4 grid steps of 128 rows
    idx2 = jax.random.randint(k_idx2, (B2, T2), 0, vocab_size, dtype=jnp.int32)
    tgt2 = jax.random.randint(k_tgt2, (B2, T2), 0, vocab_size, dtype=jnp.int32)
    logits2, loss2 = bigram_forward(idx2, tgt2, table, row_tile=128)
    jax.block_until_ready((logits2, loss2))
    ref_logits2, ref_loss2 = reference_forward(idx2, tgt2, table)
    assert jnp.allclose(logits2, ref_logits2, atol=1e-5, rtol=1e-5)
    assert jnp.allclose(loss2, ref_loss2, atol=1e-5, rtol=1e-5)

    # --- multi-step grid at the default (large) tile ---
    B3, T3 = 16, 128          # N = 2048 -> 2 grid steps of 1024 rows
    idx3 = jax.random.randint(k_idx3, (B3, T3), 0, vocab_size, dtype=jnp.int32)
    tgt3 = jax.random.randint(k_tgt3, (B3, T3), 0, vocab_size, dtype=jnp.int32)
    logits3, loss3 = bigram_forward(idx3, tgt3, table)
    jax.block_until_ready((logits3, loss3))
    ref_logits3, ref_loss3 = reference_forward(idx3, tgt3, table)
    assert jnp.allclose(logits3, ref_logits3, atol=1e-5, rtol=1e-5)
    assert jnp.allclose(loss3, ref_loss3, atol=1e-5, rtol=1e-5)

    # TODO(synk): generate() uses torch.multinomial autoregressive sampling,
    # which is host-side control flow and is not implemented as a Pallas kernel.

    print("KERNEL_OK")
</pallas_src>

<mosaic_0001>
module attributes {stable_mosaic.version = 11 : i64} {
  func.func @kernel(%arg0: i32, %arg1: memref<16x1xi32, #tpu.memory_space<vmem>>, %arg2: memref<16x1xi32, #tpu.memory_space<vmem>>, %arg3: memref<128x128xf32, #tpu.memory_space<vmem>>, %arg4: memref<16x128xf32, #tpu.memory_space<vmem>>, %arg5: memref<16x1xf32, #tpu.memory_space<vmem>>) attributes {dimension_semantics = [#tpu.dimension_semantics<parallel>], iteration_bounds = array<i64: 1>, scalar_prefetch = 0 : i64, scratch_operands = 0 : i64, tpu.core_type = #tpu.core_type<tc>, window_params = [{transform_indices = @transform_0, window_bounds = array<i64: 16, 1>}, {transform_indices = @transform_1, window_bounds = array<i64: 16, 1>}, {pipeline_mode = #tpu.pipeline_mode<synchronous>, transform_indices = @transform_2, window_bounds = array<i64: 128, 128>}, {transform_indices = @transform_3, window_bounds = array<i64: 16, 128>}, {transform_indices = @transform_4, window_bounds = array<i64: 16, 1>}]} {
    %c0 = arith.constant 0 : index
    %c0_0 = arith.constant 0 : index
    %0 = vector.load %arg1[%c0, %c0_0] : memref<16x1xi32, #tpu.memory_space<vmem>>, vector<16x1xi32>
    %c0_1 = arith.constant 0 : index
    %c0_2 = arith.constant 0 : index
    %1 = vector.load %arg2[%c0_1, %c0_2] : memref<16x1xi32, #tpu.memory_space<vmem>>, vector<16x1xi32>
    %2 = tpu.iota {dimensions = array<i32: 1>} : vector<16x128xi32>
    %3 = vector.broadcast %0 : vector<16x1xi32> to vector<16x128xi32>
    %4 = arith.cmpi eq, %2, %3 : vector<16x128xi32>
    %5 = arith.extui %4 : vector<16x128xi1> to vector<16x128xi32>
    %6 = arith.sitofp %5 : vector<16x128xi32> to vector<16x128xf32>
    %c0_3 = arith.constant 0 : index
    %c0_4 = arith.constant 0 : index
    %7 = vector.load %arg3[%c0_3, %c0_4] : memref<128x128xf32, #tpu.memory_space<vmem>>, vector<128x128xf32>
    %cst = arith.constant dense<0.000000e+00> : vector<16x128xf32>
    %8 = tpu.matmul %6, %7, %cst {dimension_numbers = #tpu.dot_dimension_numbers<[1], [0], [0], [1], [0, 0, 1, 1], [], []>} : vector<16x128xf32>, vector<128x128xf32>, vector<16x128xf32> -> vector<16x128xf32>
    %c0_5 = arith.constant 0 : index
    %c0_6 = arith.constant 0 : index
    %9 = vector.load %arg4[%c0_5, %c0_6] : memref<16x128xf32, #tpu.memory_space<vmem>>, vector<16x128xf32>
    tpu.vector_store %arg4[%c0_5, %c0_6], %8 {strides = array<i32>} : memref<16x128xf32, #tpu.memory_space<vmem>>, vector<16x128xf32>,
    %c65_i32 = arith.constant 65 : i32
    %10 = vector.broadcast %c65_i32 : i32 to vector<16x128xi32>
    %11 = arith.cmpi slt, %2, %10 : vector<16x128xi32>
    %cst_7 = arith.constant 0xFF800000 : f32
    %12 = vector.broadcast %cst_7 : f32 to vector<16x128xf32>
    %13 = arith.select %11, %8, %12 : vector<16x128xi1>, vector<16x128xf32>
    %cst_8 = arith.constant dense<0xFF800000> : vector<16xf32>
    %14 = vector.multi_reduction <maximumf>, %13, %cst_8 [1] : vector<16x128xf32> to vector<16xf32>
    %15 = vector.shape_cast %14 : vector<16xf32> to vector<16x1xf32>
    %16 = vector.broadcast %15 : vector<16x1xf32> to vector<16x128xf32>
    %17 = arith.subf %13, %16 : vector<16x128xf32>
    %18 = math.exp %17 : vector<16x128xf32>
    %cst_9 = arith.constant dense<0.000000e+00> : vector<16xf32>
    %19 = vector.multi_reduction <add>, %18, %cst_9 [1] : vector<16x128xf32> to vector<16xf32>
    %20 = vector.shape_cast %19 : vector<16xf32> to vector<16x1xf32>
    %21 = math.log %20 : vector<16x1xf32>
    %22 = arith.addf %15, %21 : vector<16x1xf32>
    %23 = vector.broadcast %1 : vector<16x1xi32> to vector<16x128xi32>
    %24 = arith.cmpi eq, %2, %23 : vector<16x128xi32>
    %cst_10 = arith.constant 0.000000e+00 : f32
    %25 = vector.broadcast %cst_10 : f32 to vector<16x128xf32>
    %26 = arith.select %24, %8, %25 : vector<16x128xi1>, vector<16x128xf32>
    %cst_11 = arith.constant dense<0.000000e+00> : vector<16xf32>
    %27 = vector.multi_reduction <add>, %26, %cst_11 [1] : vector<16x128xf32> to vector<16xf32>
    %28 = vector.shape_cast %27 : vector<16xf32> to vector<16x1xf32>
    %29 = tpu.iota {dimensions = array<i32: 0>} : vector<16x1xi32>
    %c16_i32 = arith.constant 16 : i32
    %30 = arith.muli %arg0, %c16_i32 : i32
    %31 = vector.broadcast %30 : i32 to vector<16x1xi32>
    %32 = arith.addi %29, %31 : vector<16x1xi32>
    %c16_i32_12 = arith.constant 16 : i32
    %33 = vector.broadcast %c16_i32_12 : i32 to vector<16x1xi32>
    %34 = arith.cmpi slt, %32, %33 : vector<16x1xi32>
    %35 = arith.subf %22, %28 : vector<16x1xf32>
    %cst_13 = arith.constant 0.000000e+00 : f32
    %36 = vector.broadcast %cst_13 : f32 to vector<16x1xf32>
    %37 = arith.select %34, %35, %36 : vector<16x1xi1>, vector<16x1xf32>
    %c0_14 = arith.constant 0 : index
    %c0_15 = arith.constant 0 : index
    %38 = vector.load %arg5[%c0_14, %c0_15] : memref<16x1xf32, #tpu.memory_space<vmem>>, vector<16x1xf32>
    tpu.vector_store %arg5[%c0_14, %c0_15], %37 {strides = array<i32>} : memref<16x1xf32, #tpu.memory_space<vmem>>, vector<16x1xf32>,
    return
  }
  func.func @transform_0(%arg0: i32) -> (i32, i32) {
    %c0_i32 = arith.constant 0 : i32
    %c0_i32_0 = arith.constant 0 : i32
    return %arg0, %c0_i32 : i32, i32
  }
  func.func @transform_1(%arg0: i32) -> (i32, i32) {
    %c0_i32 = arith.constant 0 : i32
    %c0_i32_0 = arith.constant 0 : i32
    return %arg0, %c0_i32 : i32, i32
  }
  func.func @transform_2(%arg0: i32) -> (i32, i32) {
    %c0_i32 = arith.constant 0 : i32
    %c0_i32_0 = arith.constant 0 : i32
    %c0_i32_1 = arith.constant 0 : i32
    return %c0_i32, %c0_i32_0 : i32, i32
  }
  func.func @transform_3(%arg0: i32) -> (i32, i32) {
    %c0_i32 = arith.constant 0 : i32
    %c0_i32_0 = arith.constant 0 : i32
    return %arg0, %c0_i32 : i32, i32
  }
  func.func @transform_4(%arg0: i32) -> (i32, i32) {
    %c0_i32 = arith.constant 0 : i32
    %c0_i32_0 = arith.constant 0 : i32
    return %arg0, %c0_i32 : i32, i32
  }
}

</mosaic_0001>

<bundles_post_ra>
// kernel: tpu_custom_call.1
= control target key start
LH: loop header
LB: loop body
LE: loop exit
PB: predicated region body
PF: predicated region fallthrough
CT: control target
= control target key end

     0   :  { %10 = vsyncpa [#allocation3], 0  ;;  %s317_s0 = inlined_call_operand.vmem [shape: s32[16,1], index: 0, kind: input, shape index: {}]   ;;  %s318_s1 = inlined_call_operand.vmem [shape: s32[16,1], index: 1, kind: input, shape index: {}]   ;;  %s319_s2 = inlined_call_operand.hbm [shape: f32[128,128], index: 2, kind: input, shape index: {}]   ;;  %s320_s3 = inlined_call_operand.hbm [shape: f32[16,128], index: 3, kind: output, shape index: {0}]   ;;  %s321_s4 = inlined_call_operand.vmem [shape: f32[16,1], index: 4, kind: output, shape index: {1}]  }
   0x1   :  { %11 = vsyncpa [#allocation4], 0  ;;  %s20_s17 = sshll.u32 %s319_s2, 4  ;;  %s256_s18 = smov [#allocation2]   ;;  %s21_s17 = int_to_ptr.hbm [resolvable:$true] %s20_s17 }
   0x2   :  { %s22_s19 = sshll.u32 %s256_s18, 4  ;;  %s257_s20 = smov 128   ;;  %s23_s19 = int_to_ptr.vmem [resolvable:$true] %s22_s19 }
   0x3   :  { %s258_s21 = smov 8  }
   0x4   :  { %28 = dma.hbm_to_vmem [thread:$0]  %s21_s17, 2048, %s23_s19, [#allocation3], %s257_s20, %s257_s20, %s258_s21  }
   0x5   :  { %252 = dma.done.wait [#allocation3], 2048  }
   0x6   :  { %253 = vsyncadd [#allocation3], 4294965248  ;;  %v259_v0 = vmov 0   ;;  %v33_v1 = vld [vmem:[%s317_s0] sm:$0xff]  ;;  %v66_v2 = vld [vmem:[#allocation2 + $0x78] sm:$0xff]  ;;  %v37_v21 = vlaneseq  ;;  %v260_v24 = vmov 1.0  }
   0x7   :  { %194 = vset.pattern.permute.xlu0 %v259_v0  ;;  %195 = vset.pattern.permute.xlu2 %v259_v0  ;;  %v65_v3 = vld [vmem:[#allocation2 + $0x70] sm:$0xff]  ;;  %v64_v4 = vld [vmem:[#allocation2 + $0x68] sm:$0xff]  ;;  %v63_v5 = vld [vmem:[#allocation2 + $0x60] sm:$0xff]  ;;  %s151_s5 = sshll.u32 %s320_s3, 4  ;;  %vm142_vm5 = vcmask 7168   ;;  %s152_s5 = int_to_ptr.hbm [resolvable:$true] %s151_s5 }
   0x8   :  { %40 = vperm.xlu0 %194, %v33_v1   ;;  %67 = vmatpush.msra.mxu0 %v66_v2  ;;  %v34_v6 = vld [vmem:[%s317_s0 + $0x8] sm:$0xff]  ;;  %v62_v7 = vld [vmem:[#allocation2 + $0x58] sm:$0xff]  ;;  %v61_v8 = vld [vmem:[#allocation2 + $0x50] sm:$0xff]  ;;  %v38_v22 = vand.u32 127, %v37_v21 }
   0x9   :  { %172 = vmatpush.msra.mxu1 %v66_v2  ;;  %v60_v9 = vld [vmem:[#allocation2 + $0x48] sm:$0xff]  ;;  %v59_v10 = vld [vmem:[#allocation2 + $0x40] sm:$0xff]  ;;  %v58_v11 = vld [vmem:[#allocation2 + $0x38] sm:$0xff] }
   0xa   :  { %68 = vmatpush.msra.mxu0 %v65_v3  ;;  %v57_v12 = vld [vmem:[#allocation2 + $0x30] sm:$0xff]  ;;  %v56_v13 = vld [vmem:[#allocation2 + $0x28] sm:$0xff]  ;;  %v55_v14 = vld [vmem:[#allocation2 + $0x20] sm:$0xff]  ;;  %vm92_vm3 = vcmp.lt.s32.totalorder %v38_v22, 65 }
   0xb   :  { %173 = vmatpush.msra.mxu1 %v65_v3  ;;  %v54_v15 = vld [vmem:[#allocation2 + $0x18] sm:$0xff]  ;;  %v53_v16 = vld [vmem:[#allocation2 + $0x10] sm:$0xff]  ;;  %v52_v17 = vld [vmem:[#allocation2 + $0x8] sm:$0xff] }
   0xc   :  { %69 = vmatpush.msra.mxu0 %v64_v4  ;;  %v51_v18 = vld [vmem:[#allocation2] sm:$0xff]  ;;  %v36_v20 = vld [vmem:[%s318_s1 + $0x8] sm:$0xff] }
   0xd   :  { %174 = vmatpush.msra.mxu1 %v64_v4  ;;  %v35_v19 = vld [vmem:[%s318_s1] sm:$0xff]  ;;  %s261_s1 = smov [#allocation5]  }
   0xe   :  { %70 = vmatpush.msra.mxu0 %v63_v5  ;;  %116 = vperm.xlu2 %195, %v35_v19   ;;  %s149_s28 = sshll.u32 %s261_s1, 4  ;;  %s150_s28 = int_to_ptr.vmem [resolvable:$true] %s149_s28 }
   0xf   :  { %175 = vmatpush.msra.mxu1 %v63_v5 }
  0x10   :  { %43 = vperm.xlu0 %194, %v34_v6   ;;  %71 = vmatpush.msra.mxu0 %v62_v7 }
  0x11   :  { %176 = vmatpush.msra.mxu1 %v62_v7 }
  0x12   :  { %72 = vmatpush.msra.mxu0 %v61_v8 }
  0x13   :  { %177 = vmatpush.msra.mxu1 %v61_v8 }
  0x14   :  { %73 = vmatpush.msra.mxu0 %v60_v9 }
  0x15   :  { %178 = vmatpush.msra.mxu1 %v60_v9 }
  0x16   :  { %74 = vmatpush.msra.mxu0 %v59_v10  ;;  %119 = vperm.xlu2 %195, %v36_v20  }
  0x17   :  { %179 = vmatpush.msra.mxu1 %v59_v10 }
  0x18   :  { %75 = vmatpush.msra.mxu0 %v58_v11 }
  0x19   :  { %180 = vmatpush.msra.mxu1 %v58_v11 }
  0x1a   :  { %76 = vmatpush.msra.mxu0 %v57_v12 }
  0x1b   :  { %181 = vmatpush.msra.mxu1 %v57_v12 }
  0x1c   :  { %77 = vmatpush.msra.mxu0 %v56_v13 }
  0x1d   :  { %182 = vmatpush.msra.mxu1 %v56_v13 }
  0x1e   :  { %78 = vmatpush.msra.mxu0 %v55_v14 }
  0x1f   :  { %183 = vmatpush.msra.mxu1 %v55_v14 }
  0x20   :  { %79 = vmatpush.msra.mxu0 %v54_v15 }
  0x21   :  { %184 = vmatpush.msra.mxu1 %v54_v15 }
  0x22   :  { %80 = vmatpush.msra.mxu0 %v53_v16 }
  0x23   :  { %185 = vmatpush.msra.mxu1 %v53_v16 }
  0x24   :  { %81 = vmatpush.msra.mxu0 %v52_v17 }
  0x25   :  { %186 = vmatpush.msra.mxu1 %v52_v17 }
  0x26   :  { %82 = vmatpush.msra.mxu0 %v51_v18 }
  0x27   :  { %187 = vmatpush.msra.mxu1 %v51_v18 }
  0x68   :  { %v117_v26 = vpop.permute.xlu2 %116 }
  0x69   :  { %vm121_vm2 = vcmp.eq.s32.totalorder %v38_v22, %v117_v26 }
  0x70   :  { %v120_v40 = vpop.permute.xlu2 %119 }
  0x71   :  { %vm122_vm4 = vcmp.eq.s32.totalorder %v38_v22, %v120_v40 }
  0x7a   :  { %v41_v23 = vpop.permute.xlu0 %40 }
  0x7b   :  { %vm45_vm0 = vcmp.eq.s32.totalorder %v38_v22, %v41_v23 }
  0x7c   :  { %170 = vmatmul.msk.f32.vlgmr.msra.gmra.mxu0 %vm45_vm0, %v260_v24 }
  0x82   :  { %v44_v25 = vpop.permute.xlu0 %43 }
  0x83   :  { %vm46_vm1 = vcmp.eq.s32.totalorder %v38_v22, %v44_v25 }
  0x84   :  { %171 = vmatmul.msk.f32.vlgmr.msra.gmra.mxu1 %vm46_vm1, %v260_v24 }
  0xf9   :  { %v84_v27 = vpop.f32.mrf.mxu0 }
  0xfa   :  { %90 = vst [vmem:[#allocation5] sm:$0xff] %v84_v27  ;;  %v123_v28 = vsel %vm121_vm2, %v84_v27, 0.0  ;;  %v93_v29 = vsel %vm92_vm3, %v84_v27, -inf }
  0xfb   :  { %125 = vadd.xlane.f32.xlu2 %v123_v28  ;;  %95 = vmax.xlane.f32.xlu1 %v93_v29 }
 0x101   :  { %v87_v30 = vpop.f32.mrf.mxu1 }
 0x102   :  { %91 = vst [vmem:[#allocation5 + $0x8] sm:$0xff] %v87_v30  ;;  %v94_v31 = vsel %vm92_vm3, %v87_v30, -inf  ;;  %v124_v41 = vsel %vm122_vm4, %v87_v30, 0.0 }
 0x103   :  { %97 = vmax.xlane.f32.xlu1 %v94_v31  ;;  %157 = dma.vmem_to_hbm [thread:$0]  %s150_s28, 256, %s152_s5, [#allocation4], %s257_s20, %s257_s20, %s258_s21  }
 0x16e   :  { %v96_v32 = vpop.xlane.xlu1 %95  ;;  %v126_v47 = vpop.xlane.xlu2 %125 }
 0x16f   :  { %v99_v33 = vsub.f32 %v93_v29, %v96_v32 }
 0x171   :  { %v101_v34 = vmul.f32 1.442695, %v99_v33 }
 0x173   :  { %196 = vpow2.f32 %v101_v34 }
 0x176   :  { %v98_v35 = vpop.xlane.xlu1 %97 }
 0x177   :  { %v100_v36 = vsub.f32 %v94_v31, %v98_v35 }
 0x179   :  { %v197_v37 = vpop.eup %196  ;;  %v103_v38 = vmul.f32 1.442695, %v100_v36 }
 0x17a   :  { %105 = vadd.xlane.f32.xlu0 %v197_v37 }
 0x17b   :  { %198 = vpow2.f32 %v103_v38 }
 0x181   :  { %v199_v39 = vpop.eup %198 }
 0x182   :  { %107 = vadd.xlane.f32.xlu1 %v199_v39 }
 0x18a   :  { %127 = vadd.xlane.f32.xlu1 %v124_v41 }
 0x1ed   :  { %v106_v42 = vpop.xlane.xlu0 %105 }
 0x1ee   :  { %200 = vlog2.f32 %v106_v42 }
 0x1f4   :  { %v201_v43 = vpop.eup %200 }
 0x1f5   :  { %v110_v44 = vmul.f32 0.6931472, %v201_v43  ;;  %v108_v45 = vpop.xlane.xlu1 %107 }
 0x1f6   :  { %202 = vlog2.f32 %v108_v45 }
 0x1f7   :  { %v113_v46 = vadd.f32 %v110_v44, %v96_v32 }
 0x1f9   :  { %v138_v48 = vsub.f32 %v113_v46, %v126_v47 }
 0x1fb   :  { %143 = vst.msk [vmem:[%s321_s4] sm:$0xff] %vm142_vm5, %v138_v48 }
 0x1fc   :  { %v203_v49 = vpop.eup %202 }
 0x1fd   :  { %v112_v50 = vmul.f32 0.6931472, %v203_v49  ;;  %v128_v52 = vpop.xlane.xlu1 %127 }
 0x1ff   :  { %v114_v51 = vadd.f32 %v112_v50, %v98_v35 }
 0x201   :  { %v139_v53 = vsub.f32 %v114_v51, %v128_v52 }
 0x203   :  { %144 = vst.msk [vmem:[%s321_s4 + $0x8] sm:$0xff] %vm142_vm5, %v139_v53 }
 0x204   :  { %254 = dma.done.wait [#allocation4], 256  }
 0x205   :  { %255 = vsyncadd [#allocation4], 4294967040 }
 0x206   :  { %166 = vsyncpa [#allocation3], 1 }
 0x207   :  { %167 = vsyncpa [#allocation4], 1 }

</bundles_post_ra>
